<compile_context>
chip_gen: v5e
topology: v5e:2x2
jax: 0.10.0
libtpu: 0.0.40
codegen_flags: <defaults>
</compile_context>

<pallas_src>
import jax
import jax.numpy as jnp
from jax.experimental import pallas as pl
from jax.experimental.pallas import tpu as pltpu

IGNORE_INDEX = -100


def _ce_rows_kernel(gt_ref, x_ref, mask_ref, ce_ref):
    """Per-row masked log-softmax cross-entropy for one (rt, D) row tile.

    gt_ref   : (1, rt, 1) int32  targets (already broadcast over L)
    x_ref    : (1, rt, D) float  logits in native dtype (cast to f32 here)
    mask_ref : (rt, D)    f32    additive logit-mask rows for this row tile
    ce_ref   : (1, rt, 1) f32    per-row un-weighted CE (0 where gt == -100)
    """
    x = x_ref[0].astype(jnp.float32) + mask_ref[...]                 # (rt, D)

    # numerically stable log-sum-exp over the class dim (lanes)
    m = jnp.max(x, axis=-1, keepdims=True)                           # (rt, 1)
    lse = jnp.log(jnp.sum(jnp.exp(x - m), axis=-1, keepdims=True)) + m

    # gather the target logit via a one-hot compare against a class-id iota
    tgt = gt_ref[0]                                                  # (rt, 1)
    ids = jax.lax.broadcasted_iota(jnp.int32, x.shape, 1)            # (rt, D)
    tgt_logit = jnp.sum(jnp.where(ids == tgt, x, 0.0), axis=-1, keepdims=True)

    # ignore_index handling: loss = 0 for ignored targets
    ce_ref[0] = jnp.where(tgt != IGNORE_INDEX, lse - tgt_logit, 0.0)


def adaptor_loss_cel(gt, layer_logits, logit_mask, weights_matrix,
                     *, vmem_budget_bytes=4 * 1024 * 1024):
    """gt: (B, T) int; layer_logits: (B, T, L, D) float (any dtype);
    logit_mask: (1, T, D) float or None; weights_matrix: (T, L) float."""
    B, T, L, D = layer_logits.shape
    G = T * L

    # Flat row views -- no dtype upcast of the big tensor, contiguous reshape.
    x3 = layer_logits.reshape(B, G, D)
    gt3 = jnp.broadcast_to(
        gt.astype(jnp.int32)[:, :, None], (B, T, L)
    ).reshape(B, G, 1)                                   # tiny (B*G int32)

    if logit_mask is None:
        mask_rows = jnp.zeros((G, D), jnp.float32)
    else:
        mask_rows = jnp.broadcast_to(
            logit_mask.reshape(1, T, 1, D).astype(jnp.float32), (1, T, L, D)
        ).reshape(G, D)                                  # B-independent, small

    # Row-tile size: fill ~vmem_budget_bytes per logits buffer, multiple of 8,
    # capped at 1024 rows; falls back to the full G for small problems.
    itemsize = jnp.dtype(layer_logits.dtype).itemsize
    rt = vmem_budget_bytes // max(1, D * itemsize)
    rt = max(8, min(1024, int(rt)))
    rt -= rt % 8
    if rt >= G:
        rt = G
    n_inner = pl.cdiv(G, rt)   # last tile may be partial; OOB rows never stored

    ce = pl.pallas_call(
        _ce_rows_kernel,
        out_shape=jax.ShapeDtypeStruct((B, G, 1), jnp.float32),
        grid=(n_inner, B),     # B fastest -> mask block (indexed by j) reused
        in_specs=[
            pl.BlockSpec((1, rt, 1), lambda j, b: (b, j, 0)),   # gt rows
            pl.BlockSpec((1, rt, D), lambda j, b: (b, j, 0)),   # logits rows
            pl.BlockSpec((rt, D),    lambda j, b: (j, 0)),      # mask rows
        ],
        out_specs=pl.BlockSpec((1, rt, 1), lambda j, b: (b, j, 0)),
        compiler_params=pltpu.CompilerParams(
            dimension_semantics=("parallel", "parallel"),
            vmem_limit_bytes=32 * 1024 * 1024,
        ),
    )(gt3, x3, mask_rows)

    # Tiny epilogue (R = B*T*L floats): weight and mean, matching the module.
    w = weights_matrix.astype(jnp.float32)
    return jnp.mean(ce.reshape(B, T, L) * w[None, :, :])


def make_weights_matrix(t_weights, l_weights):
    """torch: (l_weights.unsqueeze(0) * t_weights.unsqueeze(0).T) normalized."""
    w = l_weights[None, :] * t_weights[:, None]          # (T, L)
    return w / jnp.sum(w) * float(w.size)


def ref_loss(gt, layer_logits, logit_mask, weights_matrix):
    """Pure-JAX reference mirroring the PyTorch forward."""
    B, T, L, D = layer_logits.shape
    x = layer_logits.astype(jnp.float32)
    if logit_mask is not None:
        x = x + logit_mask.reshape(1, T, 1, D).astype(jnp.float32)
    lse = jax.nn.logsumexp(x, axis=-1)                                   # (B,T,L)
    gt_e = jnp.broadcast_to(gt[:, :, None], (B, T, L))
    safe = jnp.clip(gt_e, 0, D - 1)
    tgt = jnp.take_along_axis(x, safe[..., None], axis=-1)[..., 0]
    ce = jnp.where(gt_e == IGNORE_INDEX, 0.0, lse - tgt)
    return jnp.mean(ce * weights_matrix[None].astype(jnp.float32))


if __name__ == "__main__":
    B, T, L, D = 2, 8, 4, 32

    key = jax.random.PRNGKey(0)
    k1, k2, k3, k4, k5 = jax.random.split(key, 5)

    # bf16 logits: the kernel consumes the native dtype directly (no HBM upcast).
    layer_logits = jax.random.normal(k1, (B, T, L, D), dtype=jnp.float32).astype(jnp.bfloat16)
    gt = jax.random.randint(k2, (B, T), 0, D, dtype=jnp.int32)
    gt = gt.at[0, 3].set(IGNORE_INDEX)  # exercise ignore_index=-100

    logit_mask = 0.5 * jax.random.normal(k3, (1, T, D), dtype=jnp.float32)
    t_weights = jax.random.uniform(k4, (T,), minval=0.5, maxval=1.5, dtype=jnp.float32)
    l_weights = jax.random.uniform(k5, (L,), minval=0.5, maxval=1.5, dtype=jnp.float32)
    weights_matrix = make_weights_matrix(t_weights, l_weights)

    loss = adaptor_loss_cel(gt, layer_logits, logit_mask, weights_matrix)
    loss = jax.block_until_ready(loss)

    ref = ref_loss(gt, layer_logits, logit_mask, weights_matrix)
    assert jnp.allclose(loss, ref, rtol=1e-4, atol=1e-4), (float(loss), float(ref))

    print("KERNEL_OK")
</pallas_src>

<mosaic_0001>
module attributes {stable_mosaic.version = 11 : i64} {
  func.func @_ce_rows_kernel(%arg0: i32, %arg1: i32, %arg2: memref<1x32x1xi32, #tpu.memory_space<vmem>>, %arg3: memref<1x32x32xbf16, #tpu.memory_space<vmem>>, %arg4: memref<32x32xf32, #tpu.memory_space<vmem>>, %arg5: memref<1x32x1xf32, #tpu.memory_space<vmem>>) attributes {dimension_semantics = [#tpu.dimension_semantics<parallel>, #tpu.dimension_semantics<parallel>], iteration_bounds = array<i64: 1, 2>, scalar_prefetch = 0 : i64, scratch_operands = 0 : i64, tpu.core_type = #tpu.core_type<tc>, window_params = [{transform_indices = @transform_0, window_bounds = array<i64: 1, 32, 1>}, {transform_indices = @transform_1, window_bounds = array<i64: 1, 32, 32>}, {transform_indices = @transform_2, window_bounds = array<i64: 32, 32>}, {transform_indices = @transform_3, window_bounds = array<i64: 1, 32, 1>}]} {
    %c0 = arith.constant 0 : index
    %c0_0 = arith.constant 0 : index
    %c0_1 = arith.constant 0 : index
    %0 = vector.load %arg3[%c0, %c0_0, %c0_1] : memref<1x32x32xbf16, #tpu.memory_space<vmem>>, vector<1x32x32xbf16>
    %1 = vector.shape_cast %0 : vector<1x32x32xbf16> to vector<32x32xbf16>
    %2 = arith.extf %1 : vector<32x32xbf16> to vector<32x32xf32>
    %c0_2 = arith.constant 0 : index
    %c0_3 = arith.constant 0 : index
    %3 = vector.load %arg4[%c0_2, %c0_3] : memref<32x32xf32, #tpu.memory_space<vmem>>, vector<32x32xf32>
    %4 = arith.addf %2, %3 : vector<32x32xf32>
    %cst = arith.constant dense<0xFF800000> : vector<32xf32>
    %5 = vector.multi_reduction <maximumf>, %4, %cst [1] : vector<32x32xf32> to vector<32xf32>
    %6 = vector.shape_cast %5 : vector<32xf32> to vector<32x1xf32>
    %7 = vector.broadcast %6 : vector<32x1xf32> to vector<32x32xf32>
    %8 = arith.subf %4, %7 : vector<32x32xf32>
    %9 = math.exp %8 : vector<32x32xf32>
    %cst_4 = arith.constant dense<0.000000e+00> : vector<32xf32>
    %10 = vector.multi_reduction <add>, %9, %cst_4 [1] : vector<32x32xf32> to vector<32xf32>
    %11 = vector.shape_cast %10 : vector<32xf32> to vector<32x1xf32>
    %12 = math.log %11 : vector<32x1xf32>
    %13 = arith.addf %12, %6 : vector<32x1xf32>
    %c0_5 = arith.constant 0 : index
    %c0_6 = arith.constant 0 : index
    %c0_7 = arith.constant 0 : index
    %14 = vector.load %arg2[%c0_5, %c0_6, %c0_7] : memref<1x32x1xi32, #tpu.memory_space<vmem>>, vector<1x32x1xi32>
    %15 = vector.shape_cast %14 : vector<1x32x1xi32> to vector<32x1xi32>
    %16 = tpu.iota {dimensions = array<i32: 1>} : vector<32x32xi32>
    %17 = vector.broadcast %15 : vector<32x1xi32> to vector<32x32xi32>
    %18 = arith.cmpi eq, %16, %17 : vector<32x32xi32>
    %cst_8 = arith.constant 0.000000e+00 : f32
    %19 = vector.broadcast %cst_8 : f32 to vector<32x32xf32>
    %20 = arith.select %18, %4, %19 : vector<32x32xi1>, vector<32x32xf32>
    %cst_9 = arith.constant dense<0.000000e+00> : vector<32xf32>
    %21 = vector.multi_reduction <add>, %20, %cst_9 [1] : vector<32x32xf32> to vector<32xf32>
    %22 = vector.shape_cast %21 : vector<32xf32> to vector<32x1xf32>
    %c-100_i32 = arith.constant -100 : i32
    %23 = vector.broadcast %c-100_i32 : i32 to vector<32x1xi32>
    %24 = arith.cmpi ne, %15, %23 : vector<32x1xi32>
    %25 = arith.subf %13, %22 : vector<32x1xf32>
    %cst_10 = arith.constant 0.000000e+00 : f32
    %26 = vector.broadcast %cst_10 : f32 to vector<32x1xf32>
    %27 = arith.select %24, %25, %26 : vector<32x1xi1>, vector<32x1xf32>
    %c0_11 = arith.constant 0 : index
    %c0_12 = arith.constant 0 : index
    %c0_13 = arith.constant 0 : index
    %28 = vector.load %arg5[%c0_11, %c0_12, %c0_13] : memref<1x32x1xf32, #tpu.memory_space<vmem>>, vector<1x32x1xf32>
    %29 = vector.shape_cast %28 : vector<1x32x1xf32> to vector<32x1xf32>
    %30 = vector.shape_cast %27 : vector<32x1xf32> to vector<1x32x1xf32>
    tpu.vector_store %arg5[%c0_11, %c0_12, %c0_13], %30 {strides = array<i32>} : memref<1x32x1xf32, #tpu.memory_space<vmem>>, vector<1x32x1xf32>,
    return
  }
  func.func @transform_0(%arg0: i32, %arg1: i32) -> (i32, i32, i32) {
    %c0_i32 = arith.constant 0 : i32
    %c0_i32_0 = arith.constant 0 : i32
    return %arg1, %arg0, %c0_i32 : i32, i32, i32
  }
  func.func @transform_1(%arg0: i32, %arg1: i32) -> (i32, i32, i32) {
    %c0_i32 = arith.constant 0 : i32
    %c0_i32_0 = arith.constant 0 : i32
    return %arg1, %arg0, %c0_i32 : i32, i32, i32
  }
  func.func @transform_2(%arg0: i32, %arg1: i32) -> (i32, i32) {
    %c0_i32 = arith.constant 0 : i32
    %c0_i32_0 = arith.constant 0 : i32
    return %arg0, %c0_i32 : i32, i32
  }
  func.func @transform_3(%arg0: i32, %arg1: i32) -> (i32, i32, i32) {
    %c0_i32 = arith.constant 0 : i32
    %c0_i32_0 = arith.constant 0 : i32
    return %arg1, %arg0, %c0_i32 : i32, i32, i32
  }
}

</mosaic_0001>

<bundles_post_ra>
// kernel: tpu_custom_call.1
= control target key start
LH: loop header
LB: loop body
LE: loop exit
PB: predicated region body
PF: predicated region fallthrough
CT: control target
= control target key end

     0   :  { %s623_s12 = smov 0   ;;  %s625_s13 = smov 0   ;;  %s730_s0 = inlined_call_operand.vmem [shape: s32[2,32,1], index: 0, kind: input, shape index: {}]   ;;  %s731_s1 = inlined_call_operand.vmem [shape: bf16[2,32,32], index: 1, kind: input, shape index: {}]   ;;  %s732_s2 = inlined_call_operand.vmem [shape: f32[32,32], index: 2, kind: input, shape index: {}]   ;;  %s733_s3 = inlined_call_operand.vmem [shape: f32[2,32,1], index: 3, kind: output, shape index: {}]  }
   0x1   :  { %s627_s14 = smov 0  }
   0x2 LB: > { %s22_s15 = sadd.s32 1, %s596_s13  ;;  %p513_p0 = scmp.ge.s32.totalorder %s600_s14, 1  ;;  %s600_s14 = sphi %s627_s14, %s13_s14   ;;  %s596_s13 = sphi %s625_s13, %s735_s13   ;;  %s592_s12 = sphi %s623_s12, %s734_s12  }
   0x3   : > { %p23_p1 = scmp.ge.s32.totalorder %s22_s15, 2  ;;  %p186_p2 = scmp.lt.s32.totalorder %s600_s14, 3 }
   0x5   : > { %s737_s15 = smov (%p23_p1, %s22_s15), 0  ;;  %p187_p3 = pnand %p513_p0, %p186_p2 }
   0x6   : > { %p233_p4 = scmp.lt.s32.totalorder (!%p187_p3), %s592_s12, 1 }
   0x7   : > { %190 = sbr.rel (%p187_p3) target bundleno = 302 (0x12e), region = 32 }
   0xc   : > { %v602_v0 = vmov 0   ;;  %s739_s12 = smov (!%p233_p4, %s592_s12), 1  ;;  %v278_v1 = vld [vmem:[%s732_s2 + $0x10] sm:$0xff]  ;;  %v276_v2 = vld [vmem:[%s732_s2] sm:$0xff]  ;;  %vm284_vm0 = vcmask 261120   ;;  %v277_v12 = vld [vmem:[%s732_s2 + $0x8] sm:$0xff]  ;;  %v337_v29 = vlaneseq }
   0xd   : > { %559 = vset.pattern.permute.xlu2 %v602_v0  ;;  %561 = vset.pattern.permute.xlu1 %v602_v0  ;;  %s523_s16 = sshll.u32 %s739_s12, 4  ;;  %s522_s17 = sshll.u32 %s739_s12, 5  ;;  %v279_v13 = vld [vmem:[%s732_s2 + $0x18] sm:$0xff]  ;;  %vm383_vm6 = vcmask 7168  }
   0xe   : > { %560 = vset.pattern.permute.xlu0 %v602_v0  ;;  %s250_s20 = scalar_lea.vmem %s731_s1, %s523_s16  ;;  %s240_s27 = scalar_lea.vmem %s730_s0, %s522_s17  ;;  %v338_v33 = vand.u32 127, %v337_v29 }
   0xf   : > { %v533_v3 = vld [vmem:[%s250_s20 + $0x8] sm:$0xff]   ;;  %v526_v4 = vld [vmem:[%s250_s20] sm:$0xff]   ;;  %v678_v21 = vld [vmem:[%s240_s27 + $0x10] sm:$0xff]  ;;  %s706_s7 = scalar_lea.vmem %s733_s3, %s522_s17 }
  0x10   : > { %v659_v5 = vld [vmem:[%s240_s27] sm:$0xff]  ;;  %v531_v6 = vunpack.c.l.bf16 %v533_v3  ;;  %v527_v7 = vunpack.c.l.bf16 %v526_v4  ;;  %v528_v10 = vunpack.c.h.bf16 %v526_v4  ;;  %v532_v11 = vunpack.c.h.bf16 %v533_v3  ;;  %v673_v18 = vld [vmem:[%s240_s27 + $0x8] sm:$0xff]  ;;  %v681_v22 = vld [vmem:[%s240_s27 + $0x18] sm:$0xff] }
  0x11   : > { %340 = vperm.xlu2 %559, %v659_v5   ;;  %vm371_vm5 = vcmp.ne.s32.totalorder %v659_v5, 4294967196  ;;  %vm372_vm7 = vcmp.ne.s32.totalorder %v673_v18, 4294967196  ;;  %vm374_vm8 = vcmp.ne.s32.totalorder %v681_v22, 4294967196  ;;  %vm373_vm9 = vcmp.ne.s32.totalorder %v678_v21, 4294967196 }
  0x12   : > { %v662_v8 = vadd.f32 %v531_v6, %v278_v1  ;;  %v280_v9 = vadd.f32 %v527_v7, %v276_v2  ;;  %v281_v16 = vadd.f32 %v528_v10, %v277_v12  ;;  %v283_v17 = vadd.f32 %v532_v11, %v279_v13 }
  0x14   : > { %v291_v14 = vsel %vm284_vm0, %v662_v8, -inf  ;;  %v285_v15 = vsel %vm284_vm0, %v280_v9, -inf  ;;  %v288_v19 = vsel %vm284_vm0, %v281_v16, -inf  ;;  %v294_v20 = vsel %vm284_vm0, %v283_v17, -inf }
  0x15   : > { %292 = vmax.xlane.f32.xlu1 %v291_v14  ;;  %286 = vmax.xlane.f32.xlu0 %v285_v15 }
  0x19   : > { %343 = vperm.xlu2 %559, %v673_v18  }
  0x1d   : > { %289 = vmax.xlane.f32.xlu0 %v288_v19  ;;  %295 = vmax.xlane.f32.xlu1 %v294_v20 }
  0x31   : > { %346 = vperm.xlu0 %560, %v678_v21  }
  0x36   : > { %349 = vperm.xlu1 %561, %v681_v22  }
  0x6b   : > { %v341_v38 = vpop.permute.xlu2 %340 }
  0x6c   : > { %vm351_vm1 = vcmp.eq.s32.totalorder %v338_v33, %v341_v38 }
  0x6d   : > { %v355_v42 = vsel %vm351_vm1, %v280_v9, 0.0 }
  0x6e   : > { %v359_v44 = vsel %vm284_vm0, %v355_v42, 0.0 }
  0x73   : > { %v344_v48 = vpop.permute.xlu2 %343 }
  0x74   : > { %vm352_vm2 = vcmp.eq.s32.totalorder %v338_v33, %v344_v48 }
  0x75   : > { %v356_v50 = vsel %vm352_vm2, %v281_v16, 0.0 }
  0x76   : > { %v362_v54 = vsel %vm284_vm0, %v356_v50, 0.0 }
  0x88   : > { %v684_v23 = vpop.xlane.xlu1 %292  ;;  %v287_v24 = vpop.xlane.xlu0 %286 }
  0x89   : > { %v299_v25 = vsub.f32 %v662_v8, %v684_v23  ;;  %v297_v26 = vsub.f32 %v280_v9, %v287_v24 }
  0x8b   : > { %v305_v27 = vmul.f32 1.442695, %v299_v25  ;;  %v301_v28 = vmul.f32 1.442695, %v297_v26 }
  0x8d   : > { %562 = vpow2.f32 %v305_v27 }
  0x8e   : > { %564 = vpow2.f32 %v301_v28 }
  0x90   : > { %v290_v30 = vpop.xlane.xlu0 %289  ;;  %v688_v31 = vpop.xlane.xlu1 %295 }
  0x91   : > { %v298_v32 = vsub.f32 %v281_v16, %v290_v30  ;;  %v300_v34 = vsub.f32 %v283_v17, %v688_v31 }
  0x93   : > { %v563_v35 = vpop.eup %562  ;;  %v303_v36 = vmul.f32 1.442695, %v298_v32  ;;  %v307_v41 = vmul.f32 1.442695, %v300_v34 }
  0x94   : > { %v565_v37 = vpop.eup %564  ;;  %v315_v39 = vsel %vm284_vm0, %v563_v35, 0.0 }
  0x95   : > { %566 = vpow2.f32 %v303_v36  ;;  %316 = vadd.xlane.f32.xlu0 %v315_v39  ;;  %v309_v40 = vsel %vm284_vm0, %v565_v37, 0.0 }
  0x96   : > { %310 = vadd.xlane.f32.xlu2 %v309_v40  ;;  %568 = vpow2.f32 %v307_v41 }
  0x9b   : > { %v567_v43 = vpop.eup %566 }
  0x9c   : > { %v312_v45 = vsel %vm284_vm0, %v567_v43, 0.0  ;;  %v569_v46 = vpop.eup %568 }
  0x9d   : > { %313 = vadd.xlane.f32.xlu1 %v312_v45  ;;  %v318_v47 = vsel %vm284_vm0, %v569_v46, 0.0 }
  0x9e   : > { %360 = vadd.xlane.f32.xlu2 %v359_v44 }
  0xa3   : > { %v347_v52 = vpop.permute.xlu0 %346 }
  0xa4   : > { %vm353_vm4 = vcmp.eq.s32.totalorder %v338_v33, %v347_v52 }
  0xa5   : > { %v357_v55 = vsel %vm353_vm4, %v662_v8, 0.0 }
  0xa6   : > { %319 = vadd.xlane.f32.xlu2 %v318_v47  ;;  %v365_v56 = vsel %vm284_vm0, %v357_v55, 0.0 }
  0xa8   : > { %v350_v49 = vpop.permute.xlu1 %349 }
  0xa9   : > { %vm354_vm3 = vcmp.eq.s32.totalorder %v338_v33, %v350_v49 }
  0xaa   : > { %v358_v51 = vsel %vm354_vm3, %v283_v17, 0.0 }
  0xab   : > { %v368_v53 = vsel %vm284_vm0, %v358_v51, 0.0 }
  0xac   : > { %369 = vadd.xlane.f32.xlu1 %v368_v53 }
  0xae   : > { %363 = vadd.xlane.f32.xlu2 %v362_v54 }
  0xb6   : > { %366 = vadd.xlane.f32.xlu2 %v365_v56 }
 0x108   : > { %v317_v1 = vpop.xlane.xlu0 %316 }
 0x109   : > { %v311_v57 = vpop.xlane.xlu2 %310 }
 0x10a   : > { %570 = vlog2.f32 %v311_v57 }
 0x110   : > { %v571_v58 = vpop.eup %570  ;;  %v314_v59 = vpop.xlane.xlu1 %313 }
 0x111   : > { %v322_v60 = vmul.f32 0.6931472, %v571_v58  ;;  %v361_v61 = vpop.xlane.xlu2 %360  ;;  %572 = vlog2.f32 %v314_v59 }
 0x113   : > { %v329_v62 = vadd.f32 %v322_v60, %v287_v24 }
 0x115   : > { %v375_v63 = vsub.f32 %v329_v62, %v361_v61 }
 0x117   : > { %v379_v0 = vsel %vm371_vm5, %v375_v63, 0.0  ;;  %v573_v2 = vpop.eup %572 }
 0x118   : > { %384 = vst.msk [vmem:[%s706_s7] sm:$0xff] %vm383_vm6, %v379_v0  ;;  %v324_v4 = vmul.f32 0.6931472, %v573_v2 }
 0x119   : > { %v320_v3 = vpop.xlane.xlu2 %319 }
 0x11a   : > { %574 = vlog2.f32 %v320_v3  ;;  %v330_v6 = vadd.f32 %v324_v4, %v290_v30 }
 0x11b   : > { %576 = vlog2.f32 %v317_v1 }
 0x11f   : > { %v370_v11 = vpop.xlane.xlu1 %369 }
 0x120   : > { %v575_v5 = vpop.eup %574 }
 0x121   : > { %v577_v7 = vpop.eup %576  ;;  %v328_v8 = vmul.f32 0.6931472, %v575_v5  ;;  %v364_v9 = vpop.xlane.xlu2 %363 }
 0x122   : > { %v376_v10 = vsub.f32 %v330_v6, %v364_v9  ;;  %v326_v13 = vmul.f32 0.6931472, %v577_v7 }
 0x123   : > { %v332_v12 = vadd.f32 %v328_v8, %v688_v31 }
 0x124   : > { %v380_v14 = vsel %vm372_vm7, %v376_v10, 0.0  ;;  %v331_v17 = vadd.f32 %v326_v13, %v684_v23 }
 0x125   : > { %385 = vst.msk [vmem:[%s706_s7 + $0x8] sm:$0xff] %vm383_vm6, %v380_v14  ;;  %v378_v15 = vsub.f32 %v332_v12, %v370_v11 }
 0x127   : > { %v382_v16 = vsel %vm374_vm8, %v378_v15, 0.0 }
 0x128   : > { %387 = vst.msk [vmem:[%s706_s7 + $0x18] sm:$0xff] %vm383_vm6, %v382_v16 }
 0x129   : > { %v367_v18 = vpop.xlane.xlu2 %366 }
 0x12a   : > { %v377_v19 = vsub.f32 %v331_v17, %v367_v18 }
 0x12c   : > { %v381_v20 = vsel %vm373_vm9, %v377_v19, 0.0 }
 0x12d   : > { %386 = vst.msk [vmem:[%s706_s7 + $0x10] sm:$0xff] %vm383_vm6, %v381_v20 }
 0x12e PF: > { %s13_s14 = sadd.s32 1, %s600_s14   ;;  %s734_s12 = smov %s596_s13 }
 0x12f   : > { %p10_p5 = scmp.ge.s32.totalorder %s13_s14, 4   ;;  %s735_s13 = smov %s737_s15 }
 0x131   :  { %12 = sbr.rel (!%p10_p5) target bundleno = 2 (0x2), region = 68 }

</bundles_post_ra>
